<compile_context>
chip_gen: v6e
topology: v6e:2x2x1
jax: 0.10.0
libtpu: 0.0.40
codegen_flags: <defaults>
</compile_context>

<pallas_src>
import jax
import jax.numpy as jnp
from jax.experimental import pallas as pl
from jax.experimental.pallas import tpu as pltpu


def _sigmoid(x):
    # exp + approx reciprocal both ride the EUP slot (free vs. VALU).
    return pl.reciprocal(1.0 + jnp.exp(-x), approx=True)


def auxnet_kernel(xt_ref, w1t_ref, b1_ref, w2t_ref, b2_ref, w3t_ref, b3_ref, out_ref):
    # xt_ref: (D, TILE_N) bf16 — BatchNorm already folded into w1t/b1.
    xt = xt_ref[...]
    h1 = _sigmoid(jnp.dot(w1t_ref[...], xt,
                          preferred_element_type=jnp.float32) + b1_ref[...])    # (L1, TILE_N) f32
    h2 = _sigmoid(jnp.dot(w2t_ref[...], h1.astype(w2t_ref.dtype),
                          preferred_element_type=jnp.float32) + b2_ref[...])    # (L2, TILE_N) f32
    logit = jnp.dot(w3t_ref[...], h2.astype(w3t_ref.dtype),
                    preferred_element_type=jnp.float32) + b3_ref[...]           # (1, TILE_N) f32
    out_ref[...] = _sigmoid(logit)                                              # lane-dense store


def init_params(key, input_dim, l1, l2):
    ks = jax.random.split(key, 3)

    def lin(k, fan_in, fan_out):
        # uniform(-1/sqrt(fan_in), 1/sqrt(fan_in)), like nn.Linear default init
        bound = 1.0 / jnp.sqrt(jnp.float32(fan_in))
        kw, kb = jax.random.split(k)
        w = jax.random.uniform(kw, (fan_in, fan_out), jnp.float32, -bound, bound)
        b = jax.random.uniform(kb, (fan_out,), jnp.float32, -bound, bound)
        return w, b

    w1, b1 = lin(ks[0], input_dim, l1)
    w2, b2 = lin(ks[1], l1, l2)
    w3, b3 = lin(ks[2], l2, 1)
    return {
        "gamma": jnp.ones((input_dim,), jnp.float32),   # BatchNorm1d weight
        "beta": jnp.zeros((input_dim,), jnp.float32),   # BatchNorm1d bias
        "w1": w1, "b1": b1, "w2": w2, "b2": b2, "w3": w3, "b3": b3,
    }


def auxnet_forward(states, embs, mask, params, *, tile_n=4096):
    # glue: concat + flatten in plain JAX
    inputs = jnp.concatenate([states, embs], axis=-1)
    input_dim = inputs.shape[-1]
    x = inputs.reshape(-1, input_dim).astype(jnp.float32)      # (N, D)
    n = x.shape[0]

    # ---- BatchNorm1d (training mode, biased variance, eps=1e-5) folded into Linear #1 ----
    mean = jnp.mean(x, axis=0)                                  # (D,)
    var = jnp.mean((x - mean) ** 2, axis=0)                     # (D,) biased
    scale = params["gamma"] * jax.lax.rsqrt(var + 1e-5)         # (D,)
    shift = params["beta"] - mean * scale                       # (D,)
    w1_eff = params["w1"] * scale[:, None]                      # (D, L1)
    b1_eff = shift @ params["w1"] + params["b1"]                # (L1,)

    # Transposed weights; bf16 matmul operands, f32 biases / accumulation.
    w1t = w1_eff.T.astype(jnp.bfloat16)                         # (L1, D)
    w2t = params["w2"].T.astype(jnp.bfloat16)                   # (L2, L1)
    w3t = params["w3"].T.astype(jnp.bfloat16)                   # (1, L2)
    b1t = b1_eff.reshape(-1, 1).astype(jnp.float32)             # (L1, 1)
    b2t = params["b2"].reshape(-1, 1).astype(jnp.float32)       # (L2, 1)
    b3t = params["b3"].reshape(1, 1).astype(jnp.float32)        # (1, 1)
    l1 = w1t.shape[0]
    l2 = w2t.shape[0]

    # Row-axis tiling (lane-dense, multiples of 128); pad N up to the grid size.
    if n >= tile_n:
        n_pad = ((n + tile_n - 1) // tile_n) * tile_n
    else:
        tile_n = ((max(n, 1) + 127) // 128) * 128
        n_pad = tile_n

    xt = x.T.astype(jnp.bfloat16)                               # (D, N)
    if n_pad != n:
        xt = jnp.pad(xt, ((0, 0), (0, n_pad - n)))              # zero cols, discarded later

    grid = (n_pad // tile_n,)

    pred_t = pl.pallas_call(
        auxnet_kernel,
        out_shape=jax.ShapeDtypeStruct((1, n_pad), jnp.float32),
        grid=grid,
        in_specs=[
            pl.BlockSpec((input_dim, tile_n), lambda i: (0, i)),   # x tile (pipelined)
            pl.BlockSpec((l1, input_dim), lambda i: (0, 0)),       # weights stay resident
            pl.BlockSpec((l1, 1), lambda i: (0, 0)),
            pl.BlockSpec((l2, l1), lambda i: (0, 0)),
            pl.BlockSpec((l2, 1), lambda i: (0, 0)),
            pl.BlockSpec((1, l2), lambda i: (0, 0)),
            pl.BlockSpec((1, 1), lambda i: (0, 0)),
        ],
        out_specs=pl.BlockSpec((1, tile_n), lambda i: (0, i)),
        compiler_params=pltpu.CompilerParams(
            dimension_semantics=("parallel",),                     # megacore sharding on v7x
            vmem_limit_bytes=32 * 1024 * 1024,                     # safe on v7x's 64 MiB VMEM
        ),
    )(xt, w1t, b1t, w2t, b2t, w3t, b3t)

    pred = pred_t.reshape(-1)[:n].reshape(-1, 1)                   # (N, 1)

    # TODO(synk): pred[mask].view(-1, 1) is dynamic-shape boolean selection — no Pallas/jit
    # equivalent; done eagerly on concrete arrays outside the kernel.
    return pred[mask.reshape(-1, 1)].reshape(-1, 1)


if __name__ == "__main__":
    key = jax.random.PRNGKey(0)
    k_states, k_embs, k_mask, k_params = jax.random.split(key, 4)

    # small shapes: batch=2, seq=8, states_dim=16, embs_dim=16 -> input_dim=32
    B, S, DS, DE = 2, 8, 16, 16
    INPUT_DIM = DS + DE
    L1, L2 = 32, 32

    states = jax.random.normal(k_states, (B, S, DS), jnp.float32)
    embs = jax.random.normal(k_embs, (B, S, DE), jnp.float32)
    mask = jax.random.bernoulli(k_mask, 0.6, (B, S))      # bool mask
    params = init_params(k_params, INPUT_DIM, L1, L2)

    out = auxnet_forward(states, embs, mask, params)
    jax.block_until_ready(out)
    print("KERNEL_OK")
</pallas_src>

<mosaic_0001>
module attributes {stable_mosaic.version = 11 : i64} {
  func.func @auxnet_kernel(%arg0: i32, %arg1: memref<32x128xbf16, #tpu.memory_space<vmem>>, %arg2: memref<32x32xbf16, #tpu.memory_space<vmem>>, %arg3: memref<32x1xf32, #tpu.memory_space<vmem>>, %arg4: memref<32x32xbf16, #tpu.memory_space<vmem>>, %arg5: memref<32x1xf32, #tpu.memory_space<vmem>>, %arg6: memref<1x32xbf16, #tpu.memory_space<vmem>>, %arg7: memref<1x1xf32, #tpu.memory_space<vmem>>, %arg8: memref<1x128xf32, #tpu.memory_space<vmem>>) attributes {dimension_semantics = [#tpu.dimension_semantics<parallel>], iteration_bounds = array<i64: 1>, scalar_prefetch = 0 : i64, scratch_operands = 0 : i64, tpu.core_type = #tpu.core_type<tc>, window_params = [{transform_indices = @transform_0, window_bounds = array<i64: 32, 128>}, {pipeline_mode = #tpu.pipeline_mode<synchronous>, transform_indices = @transform_1, window_bounds = array<i64: 32, 32>}, {pipeline_mode = #tpu.pipeline_mode<synchronous>, transform_indices = @transform_2, window_bounds = array<i64: 32, 1>}, {pipeline_mode = #tpu.pipeline_mode<synchronous>, transform_indices = @transform_3, window_bounds = array<i64: 32, 32>}, {pipeline_mode = #tpu.pipeline_mode<synchronous>, transform_indices = @transform_4, window_bounds = array<i64: 32, 1>}, {pipeline_mode = #tpu.pipeline_mode<synchronous>, transform_indices = @transform_5, window_bounds = array<i64: 1, 32>}, {pipeline_mode = #tpu.pipeline_mode<synchronous>, transform_indices = @transform_6, window_bounds = array<i64: 1, 1>}, {transform_indices = @transform_7, window_bounds = array<i64: 1, 128>}]} {
    %c0 = arith.constant 0 : index
    %c0_0 = arith.constant 0 : index
    %0 = vector.load %arg1[%c0, %c0_0] : memref<32x128xbf16, #tpu.memory_space<vmem>>, vector<32x128xbf16>
    %c0_1 = arith.constant 0 : index
    %c0_2 = arith.constant 0 : index
    %1 = vector.load %arg2[%c0_1, %c0_2] : memref<32x32xbf16, #tpu.memory_space<vmem>>, vector<32x32xbf16>
    %cst = arith.constant dense<0.000000e+00> : vector<32x128xf32>
    %2 = tpu.matmul %1, %0, %cst {dimension_numbers = #tpu.dot_dimension_numbers<[1], [0], [0], [1], [0, 0, 1, 1], [], []>} : vector<32x32xbf16>, vector<32x128xbf16>, vector<32x128xf32> -> vector<32x128xf32>
    %c0_3 = arith.constant 0 : index
    %c0_4 = arith.constant 0 : index
    %3 = vector.load %arg3[%c0_3, %c0_4] : memref<32x1xf32, #tpu.memory_space<vmem>>, vector<32x1xf32>
    %4 = vector.broadcast %3 : vector<32x1xf32> to vector<32x128xf32>
    %5 = arith.addf %2, %4 : vector<32x128xf32>
    %cst_5 = arith.constant 0.000000e+00 : f32
    %6 = vector.broadcast %cst_5 : f32 to vector<32x128xf32>
    %7 = arith.subf %6, %5 : vector<32x128xf32>
    %8 = math.exp %7 : vector<32x128xf32>
    %cst_6 = arith.constant 1.000000e+00 : f32
    %9 = vector.broadcast %cst_6 : f32 to vector<32x128xf32>
    %10 = arith.addf %9, %8 : vector<32x128xf32>
    %11 = tpu.reciprocal %10 {approx = true} : vector<32x128xf32> -> vector<32x128xf32>
    %c0_7 = arith.constant 0 : index
    %c0_8 = arith.constant 0 : index
    %12 = vector.load %arg4[%c0_7, %c0_8] : memref<32x32xbf16, #tpu.memory_space<vmem>>, vector<32x32xbf16>
    %13 = arith.truncf %11 : vector<32x128xf32> to vector<32x128xbf16>
    %cst_9 = arith.constant dense<0.000000e+00> : vector<32x128xf32>
    %14 = tpu.matmul %12, %13, %cst_9 {dimension_numbers = #tpu.dot_dimension_numbers<[1], [0], [0], [1], [0, 0, 1, 1], [], []>} : vector<32x32xbf16>, vector<32x128xbf16>, vector<32x128xf32> -> vector<32x128xf32>
    %c0_10 = arith.constant 0 : index
    %c0_11 = arith.constant 0 : index
    %15 = vector.load %arg5[%c0_10, %c0_11] : memref<32x1xf32, #tpu.memory_space<vmem>>, vector<32x1xf32>
    %16 = vector.broadcast %15 : vector<32x1xf32> to vector<32x128xf32>
    %17 = arith.addf %14, %16 : vector<32x128xf32>
    %cst_12 = arith.constant 0.000000e+00 : f32
    %18 = vector.broadcast %cst_12 : f32 to vector<32x128xf32>
    %19 = arith.subf %18, %17 : vector<32x128xf32>
    %20 = math.exp %19 : vector<32x128xf32>
    %cst_13 = arith.constant 1.000000e+00 : f32
    %21 = vector.broadcast %cst_13 : f32 to vector<32x128xf32>
    %22 = arith.addf %21, %20 : vector<32x128xf32>
    %23 = tpu.reciprocal %22 {approx = true} : vector<32x128xf32> -> vector<32x128xf32>
    %c0_14 = arith.constant 0 : index
    %c0_15 = arith.constant 0 : index
    %24 = vector.load %arg6[%c0_14, %c0_15] : memref<1x32xbf16, #tpu.memory_space<vmem>>, vector<1x32xbf16>
    %25 = arith.truncf %23 : vector<32x128xf32> to vector<32x128xbf16>
    %cst_16 = arith.constant dense<0.000000e+00> : vector<1x128xf32>
    %26 = tpu.matmul %24, %25, %cst_16 {dimension_numbers = #tpu.dot_dimension_numbers<[1], [0], [0], [1], [0, 0, 1, 1], [], []>} : vector<1x32xbf16>, vector<32x128xbf16>, vector<1x128xf32> -> vector<1x128xf32>
    %c0_17 = arith.constant 0 : index
    %c0_18 = arith.constant 0 : index
    %27 = vector.load %arg7[%c0_17, %c0_18] : memref<1x1xf32, #tpu.memory_space<vmem>>, vector<1x1xf32>
    %28 = vector.broadcast %27 : vector<1x1xf32> to vector<1x128xf32>
    %29 = arith.addf %26, %28 : vector<1x128xf32>
    %cst_19 = arith.constant 0.000000e+00 : f32
    %30 = vector.broadcast %cst_19 : f32 to vector<1x128xf32>
    %31 = arith.subf %30, %29 : vector<1x128xf32>
    %32 = math.exp %31 : vector<1x128xf32>
    %cst_20 = arith.constant 1.000000e+00 : f32
    %33 = vector.broadcast %cst_20 : f32 to vector<1x128xf32>
    %34 = arith.addf %33, %32 : vector<1x128xf32>
    %35 = tpu.reciprocal %34 {approx = true} : vector<1x128xf32> -> vector<1x128xf32>
    %c0_21 = arith.constant 0 : index
    %c0_22 = arith.constant 0 : index
    %36 = vector.load %arg8[%c0_21, %c0_22] : memref<1x128xf32, #tpu.memory_space<vmem>>, vector<1x128xf32>
    tpu.vector_store %arg8[%c0_21, %c0_22], %35 {strides = array<i32>} : memref<1x128xf32, #tpu.memory_space<vmem>>, vector<1x128xf32>,
    return
  }
  func.func @transform_0(%arg0: i32) -> (i32, i32) {
    %c0_i32 = arith.constant 0 : i32
    %c0_i32_0 = arith.constant 0 : i32
    return %c0_i32, %arg0 : i32, i32
  }
  func.func @transform_1(%arg0: i32) -> (i32, i32) {
    %c0_i32 = arith.constant 0 : i32
    %c0_i32_0 = arith.constant 0 : i32
    %c0_i32_1 = arith.constant 0 : i32
    return %c0_i32, %c0_i32_0 : i32, i32
  }
  func.func @transform_2(%arg0: i32) -> (i32, i32) {
    %c0_i32 = arith.constant 0 : i32
    %c0_i32_0 = arith.constant 0 : i32
    %c0_i32_1 = arith.constant 0 : i32
    return %c0_i32, %c0_i32_0 : i32, i32
  }
  func.func @transform_3(%arg0: i32) -> (i32, i32) {
    %c0_i32 = arith.constant 0 : i32
    %c0_i32_0 = arith.constant 0 : i32
    %c0_i32_1 = arith.constant 0 : i32
    return %c0_i32, %c0_i32_0 : i32, i32
  }
  func.func @transform_4(%arg0: i32) -> (i32, i32) {
    %c0_i32 = arith.constant 0 : i32
    %c0_i32_0 = arith.constant 0 : i32
    %c0_i32_1 = arith.constant 0 : i32
    return %c0_i32, %c0_i32_0 : i32, i32
  }
  func.func @transform_5(%arg0: i32) -> (i32, i32) {
    %c0_i32 = arith.constant 0 : i32
    %c0_i32_0 = arith.constant 0 : i32
    %c0_i32_1 = arith.constant 0 : i32
    return %c0_i32, %c0_i32_0 : i32, i32
  }
  func.func @transform_6(%arg0: i32) -> (i32, i32) {
    %c0_i32 = arith.constant 0 : i32
    %c0_i32_0 = arith.constant 0 : i32
    %c0_i32_1 = arith.constant 0 : i32
    return %c0_i32, %c0_i32_0 : i32, i32
  }
  func.func @transform_7(%arg0: i32) -> (i32, i32) {
    %c0_i32 = arith.constant 0 : i32
    %c0_i32_0 = arith.constant 0 : i32
    return %c0_i32, %arg0 : i32, i32
  }
}

</mosaic_0001>

<bundles_post_ra>
// kernel: tpu_custom_call.1
= control target key start
LH: loop header
LB: loop body
LE: loop exit
PB: predicated region body
PF: predicated region fallthrough
CT: control target
= control target key end

     0   :  { %s567_s0 = inlined_call_operand.vmem [shape: bf16[32,128], index: 0, kind: input, shape index: {}]   ;;  %s568_s1 = inlined_call_operand.vmem [shape: bf16[32,32], index: 1, kind: input, shape index: {}]   ;;  %s569_s2 = inlined_call_operand.vmem [shape: f32[32,1], index: 2, kind: input, shape index: {}]   ;;  %s570_s3 = inlined_call_operand.vmem [shape: bf16[32,32], index: 3, kind: input, shape index: {}]   ;;  %s571_s4 = inlined_call_operand.vmem [shape: f32[32,1], index: 4, kind: input, shape index: {}]   ;;  %s572_s5 = inlined_call_operand.vmem [shape: bf16[1,32], index: 5, kind: input, shape index: {}]   ;;  %s573_s6 = inlined_call_operand.<no memory space> [shape: f32[1,1], index: 6, kind: input, shape index: {}]   ;;  %s574_s7 = inlined_call_operand.hbm [shape: f32[1,128], index: 7, kind: output, shape index: {}]  }
   0x1   :  { %v12_v0 = vstv %s573_s6 }
   0x2   :  { %13 = vst [vmem:[#allocation2] sm:$0x1] %v12_v0 }
   0x3   :  { %v403_v1 = vld [vmem:[%s567_s0 + $0x8] sm:$0xff]   ;;  %vm84_vm0 = vcmask 261120   ;;  %v404_v2 = vld [vmem:[%s567_s0] sm:$0xff]   ;;  %v467_v4 = vmov 0   ;;  %v40_v5 = vld [vmem:[%s569_s2 + $0x10] sm:$0xff] }
   0x4   :  { %373 = vmatprep.subr.bf16.mxu0 %v403_v1  ;;  %v405_v3 = vld [vmem:[%s568_s1] sm:$0xff]   ;;  %401 = vset.pattern.permute.xlu0 %v467_v4  ;;  %v406_v7 = vld [vmem:[%s568_s1 + $0x8] sm:$0xff]   ;;  %v41_v8 = vld [vmem:[%s569_s2 + $0x18] sm:$0xff] }
   0x5   :  { %374 = vmatpush3.bf16.msra.mxu0 %v403_v1  ;;  %402 = vset.pattern.permute.xlu1 %v467_v4  ;;  %v38_v6 = vld [vmem:[%s569_s2] sm:$0xff]  ;;  %v39_v9 = vld [vmem:[%s569_s2 + $0x8] sm:$0xff] }
   0x6   :  { %375 = vmatprep.subr.bf16.mxu0 %v404_v2  ;;  %377 = vmatprep.mubr.msk.bf16.mxu0 %vm84_vm0, %v405_v3 }
   0x7   :  { %54 = vperm.xlu0 %401, %v40_v5   ;;  %44 = vperm.xlu1 %402, %v38_v6  }
   0x9   :  { %376 = vmatpush3.bf16.msra.mxu0 %v404_v2 }
   0xa   :  { %14 = vsyncpa [#allocation4], 0  ;;  %v168_v10 = vld [vmem:[%s571_s4 + $0x10] sm:$0xff]  ;;  %v169_v11 = vld [vmem:[%s571_s4 + $0x18] sm:$0xff]  ;;  %v468_v51 = vmov 0.0   ;;  %vm469_vm1 = vmmov 0  }
   0xb   :  { %59 = vperm.xlu0 %401, %v41_v8   ;;  %49 = vperm.xlu1 %402, %v39_v9   ;;  %v166_v12 = vld [vmem:[%s571_s4] sm:$0xff]  ;;  %v167_v13 = vld [vmem:[%s571_s4 + $0x8] sm:$0xff]  ;;  %s470_s27 = smov [#allocation3]  }
   0xc   :  { %378 = vmatmul.mubr.msk.bf16.vlgmr.msra.gmra.mxu0 %vm84_vm0, %v406_v7  ;;  %v278_v14 = vld [vmem:[#allocation2] sm:$0x1]  ;;  %v408_v50 = vld [vmem:[%s570_s3 + $0x8] sm:$0xff]   ;;  %389 = vmatprep.subr.bf16.mxu0 %v468_v51 }
   0xd   :  { %v407_v15 = vld [vmem:[%s570_s3] sm:$0xff]   ;;  %393 = vmatprep.mubr.msk.bf16.mxu0 %vm469_vm1, %v468_v51 }
   0xe   :  { %385 = vmatprep.mubr.msk.bf16.mxu1 %vm84_vm0, %v407_v15 }
   0xf   :  { %182 = vperm.xlu0 %401, %v168_v10   ;;  %187 = vperm.xlu1 %402, %v169_v11  }
  0x13   :  { %172 = vperm.xlu0 %401, %v166_v12   ;;  %177 = vperm.xlu1 %402, %v167_v13  }
  0x17   :  { %281 = vperm.xlu0 %401, %v278_v14  }
  0x82   :  { %v55_v16 = vpop.permute.xlu0 %54  ;;  %v45_v17 = vpop.permute.xlu1 %44 }
  0x86   :  { %v60_v23 = vpop.permute.xlu0 %59  ;;  %v50_v28 = vpop.permute.xlu1 %49 }
  0x8a   :  { %v183_v52 = vpop.permute.xlu0 %182  ;;  %v188_v53 = vpop.permute.xlu1 %187 }
  0x8e   :  { %v173_v56 = vpop.permute.xlu0 %172  ;;  %v178_v0 = vpop.permute.xlu1 %177 }
  0xcc   :  { %v379_v18 = vpop.f32.mrf.mxu0 }
  0xcd   :  { %v134_v19 = vadd.f32 %v379_v18, %v55_v16 }
  0xce   :  { %v125_v20 = vpop.f32.mrf.mxu0 }
  0xcf   :  { %v142_v21 = vsub.f32 0.0, %v134_v19  ;;  %v126_v22 = vadd.f32 %v125_v20, %v45_v17 }
  0xd0   :  { %v380_v24 = vpop.f32.mrf.mxu0 }
  0xd1   :  { %v148_v25 = vmul.f32 1.442695, %v142_v21  ;;  %v140_v26 = vsub.f32 0.0, %v126_v22  ;;  %v137_v27 = vadd.f32 %v380_v24, %v60_v23  ;;  %v275_v22 = vld [vmem:[%s572_s5] sm:$0x1]  ;;  %v284_v23 = vlaneseq  ;;  %s343_s5 = sshll.u32 %s470_s27, 4  ;;  %s344_s5 = int_to_ptr.vmem [resolvable:$true] %s343_s5 }
  0xd2   :  { %v128_v29 = vpop.f32.mrf.mxu0  ;;  %s445_s28 = scalar_lea.vmem %s344_s5, 16  ;;  %s449_s29 = scalar_lea.vmem %s344_s5, 32 }
  0xd3   :  { %409 = vpow2.f32 %v148_v25  ;;  %v144_v30 = vmul.f32 1.442695, %v140_v26  ;;  %v143_v31 = vsub.f32 0.0, %v137_v27  ;;  %v129_v32 = vadd.f32 %v128_v29, %v50_v28  ;;  %v282_v26 = vpop.permute.xlu0 %281  ;;  %p446_p0 = scmp.ne.s32.totalorder %s344_s5, %s445_s28  ;;  %p450_p1 = scmp.lt.s32.totalorder %s344_s5, %s344_s5 }
  0xd4   :  { %v285_v24 = vshrl.u32 %v284_v23, 7  ;;  %p451_p2 = scmp.lt.s32.totalorder %s449_s29, %s445_s28 }
  0xd5   :  { %411 = vpow2.f32 %v144_v30  ;;  %v150_v33 = vmul.f32 1.442695, %v143_v31  ;;  %v141_v34 = vsub.f32 0.0, %v129_v32 }
  0xd6   :  { %v286_v25 = vsub.s32 0, %v285_v24  ;;  %p452_p3 = por %p451_p2, %p450_p1 }
  0xd7   :  { %413 = vpow2.f32 %v150_v33  ;;  %v146_v35 = vmul.f32 1.442695, %v141_v34 }
  0xd8   :  { %v287_v27 = vrot.slane %v282_v26, %v286_v25  ;;  %p453_p4 = pnand %p452_p3, %p446_p0 }
  0xd9   :  { %415 = vpow2.f32 %v146_v35 }
  0xe0   :  { %v410_v36 = vpop.eup %409 }
  0xe1   :  { %v154_v38 = vadd.f32 1.0, %v410_v36 }
  0xe2   :  { %v412_v37 = vpop.eup %411 }
  0xe3   :  { %v152_v40 = vadd.f32 1.0, %v412_v37  ;;  %417 = vrcp.f32 %v154_v38 }
  0xe4   :  { %v414_v39 = vpop.eup %413 }
  0xe5   :  { %v155_v41 = vadd.f32 1.0, %v414_v39 }
  0xe6   :  { %v416_v42 = vpop.eup %415 }
  0xe7   :  { %419 = vrcp.f32 %v155_v41  ;;  %v153_v43 = vadd.f32 1.0, %v416_v42 }
  0xe8   :  { %421 = vrcp.f32 %v152_v40 }
  0xe9   :  { %423 = vrcp.f32 %v153_v43 }
  0xf0   :  { %v418_v44 = vpop.eup %417 }
  0xf4   :  { %v420_v45 = vpop.eup %419 }
  0xf5   :  { %v422_v46 = vpop.eup %421  ;;  %v165_v47 = vpack.c.bf16 %v420_v45, %v418_v44 }
  0xf6   :  { %v424_v48 = vpop.eup %423 }
  0xf7   :  { %381 = vmatprep.subr.bf16.mxu1 %v165_v47  ;;  %v164_v49 = vpack.c.bf16 %v424_v48, %v422_v46 }
  0xf8   :  { %382 = vmatpush3.bf16.msra.mxu1 %v165_v47 }
  0xf9   :  { %383 = vmatprep.subr.bf16.mxu1 %v164_v49 }
  0xfc   :  { %384 = vmatpush3.bf16.msra.mxu1 %v164_v49 }
  0xff   :  { %386 = vmatmul.mubr.msk.bf16.vlgmr.msra.gmra.mxu1 %vm84_vm0, %v408_v50 }
 0x1bf   :  { %v387_v54 = vpop.f32.mrf.mxu1 }
 0x1c0   :  { %v249_v55 = vadd.f32 %v387_v54, %v183_v52 }
 0x1c1   :  { %v240_v57 = vpop.f32.mrf.mxu1 }
 0x1c2   :  { %v257_v58 = vsub.f32 0.0, %v249_v55  ;;  %v241_v59 = vadd.f32 %v240_v57, %v173_v56 }
 0x1c3   :  { %v388_v60 = vpop.f32.mrf.mxu1 }
 0x1c4   :  { %v263_v61 = vmul.f32 1.442695, %v257_v58  ;;  %v255_v62 = vsub.f32 0.0, %v241_v59  ;;  %v252_v63 = vadd.f32 %v388_v60, %v188_v53 }
 0x1c5   :  { %v243_v1 = vpop.f32.mrf.mxu1 }
 0x1c6   :  { %425 = vpow2.f32 %v263_v61  ;;  %v259_v2 = vmul.f32 1.442695, %v255_v62  ;;  %v258_v3 = vsub.f32 0.0, %v252_v63  ;;  %v244_v4 = vadd.f32 %v243_v1, %v178_v0 }
 0x1c8   :  { %v265_v5 = vmul.f32 1.442695, %v258_v3  ;;  %v256_v6 = vsub.f32 0.0, %v244_v4  ;;  %427 = vpow2.f32 %v259_v2 }
 0x1ca   :  { %429 = vpow2.f32 %v265_v5  ;;  %v261_v7 = vmul.f32 1.442695, %v256_v6 }
 0x1cc   :  { %431 = vpow2.f32 %v261_v7 }
 0x1d3   :  { %v426_v8 = vpop.eup %425 }
 0x1d4   :  { %v269_v9 = vadd.f32 1.0, %v426_v8 }
 0x1d5   :  { %v428_v10 = vpop.eup %427 }
 0x1d6   :  { %433 = vrcp.f32 %v269_v9  ;;  %v267_v14 = vadd.f32 1.0, %v428_v10 }
 0x1d7   :  { %v430_v11 = vpop.eup %429 }
 0x1d8   :  { %v270_v12 = vadd.f32 1.0, %v430_v11 }
 0x1d9   :  { %v432_v13 = vpop.eup %431 }
 0x1da   :  { %435 = vrcp.f32 %v270_v12  ;;  %v268_v15 = vadd.f32 1.0, %v432_v13 }
 0x1dc   :  { %437 = vrcp.f32 %v268_v15 }
 0x1dd   :  { %439 = vrcp.f32 %v267_v14 }
 0x1e3   :  { %v434_v16 = vpop.eup %433 }
 0x1e7   :  { %v436_v17 = vpop.eup %435 }
 0x1e8   :  { %v277_v18 = vpack.c.bf16 %v436_v17, %v434_v16 }
 0x1e9   :  { %v438_v19 = vpop.eup %437 }
 0x1ea   :  { %390 = vmatpush3.bf16.msra.mxu0 %v277_v18  ;;  %v440_v20 = vpop.eup %439 }
 0x1eb   :  { %391 = vmatprep.subr.bf16.mxu0 %v468_v51  ;;  %v276_v21 = vpack.c.bf16 %v438_v19, %v440_v20 }
 0x1ee   :  { %392 = vmatpush3.bf16.msra.mxu0 %v276_v21 }
 0x1f1   :  { %394 = vmatmul.mubr.msk.bf16.vlgmr.msra.gmra.mxu0 %vm84_vm0, %v275_v22 }
 0x2b1   :  { %v325_v28 = vpop.f32.mrf.mxu0 }
 0x2b2   :  { %v326_v29 = vadd.f32 %v325_v28, %v287_v27 }
 0x2b3   :  { %v395_v30 = vpop.f32.mrf.mxu0 }
 0x2b4   :  { %v331_v31 = vsub.f32 0.0, %v326_v29 }
 0x2b5   :  { %v328_v32 = vpop.f32.mrf.mxu0 }
 0x2b6   :  { %v332_v33 = vmul.f32 1.442695, %v331_v31 }
 0x2b7   :  { %v396_v34 = vpop.f32.mrf.mxu0 }
 0x2b8   :  { %441 = vpow2.f32 %v332_v33 }
 0x2c5   :  { %v442_v35 = vpop.eup %441 }
 0x2c6   :  { %v334_v36 = vadd.f32 1.0, %v442_v35 }
 0x2c8   :  { %443 = vrcp.f32 %v334_v36 }
 0x2d5   :  { %v444_v37 = vpop.eup %443 }
 0x2d6   :  { %336 = vst [vmem:[#allocation3] sm:$0x1] %v444_v37 }
 0x2d7   :  { %456 = shalt.err (!%p453_p4)
}
 0x2d8   :  { %346 = dma.vmem_to_hbm [thread:$0]  %s344_s5, 16, %s574_s7, [#allocation4]  }
 0x2d9   :  { %465 = dma.done.wait [#allocation4], 16  }
 0x2da   :  { %466 = vsyncadd [#allocation4], 4294967280 }
 0x2db   :  { %350 = vsyncpa [#allocation4], 1 }

</bundles_post_ra>
